<compile_context>
chip_gen: v5e
topology: v5e:2x2
jax: 0.10.0
libtpu: 0.0.40
codegen_flags: <defaults>
</compile_context>

<pallas_src>
import math

import jax
import jax.numpy as jnp
from jax.experimental import pallas as pl
from jax.experimental.pallas import tpu as pltpu


def _scale_shift_kernel(x_ref, scale_ref, shift_ref, o_ref):
    # Pure VPU elementwise: (row_tile, c_tile) * (1, c_tile) + (1, c_tile)
    o_ref[...] = (x_ref[...] * scale_ref[...] + shift_ref[...]).astype(o_ref.dtype)


def _sublane_multiple(dtype):
    itemsize = jnp.dtype(dtype).itemsize
    if itemsize >= 4:
        return 8
    if itemsize == 2:
        return 16
    return 32


def _round_up(a, m):
    return ((a + m - 1) // m) * m


def _vmem_capacity_bytes():
    # Per-generation VMEM capacity; fall back to the smallest (v7x: 64 MiB/TC).
    try:
        info = pltpu.get_tpu_info()
        cap = getattr(info, "vmem_capacity_bytes", None)
        if cap:
            return int(cap)
    except Exception:
        pass
    return 64 << 20


def scale_shift(x, scale, shift, *, target_block_bytes=None,
                min_pallas_bytes=1 << 20, donate_x=False):
    """x: (..., C); scale, shift: (C,). Returns x * scale + shift (in x.dtype)."""
    orig_shape = x.shape
    C = orig_shape[-1]
    assert scale.shape == (C,) and shift.shape == (C,)

    # Params in the compute dtype: avoids f32 promotion + convert-on-store for
    # low-precision activations and halves the (tiny) param DMA.
    scale = scale.astype(x.dtype)
    shift = shift.astype(x.dtype)

    itemsize = jnp.dtype(x.dtype).itemsize
    total_bytes = x.size * itemsize

    # Tiny tensors: pallas_call launch/step overhead dominates -> let XLA fuse it.
    if total_bytes < min_pallas_bytes:
        return x * scale + shift

    x2d = x.reshape(-1, C)
    rows = x2d.shape[0]

    # --- Lane-dense fold (gcd-based): make the last dim a multiple of 128 so
    #     stores are full-width vst instead of masked vst.msk. Metadata-only. ---
    scale_row, shift_row = scale, shift
    fold = 128 // math.gcd(C, 128)
    if fold > 1 and rows % fold == 0:
        x2d = x2d.reshape(rows // fold, fold * C)   # row-major, no data movement
        scale_row = jnp.tile(scale, fold)           # tiny (fold*C,) param op
        shift_row = jnp.tile(shift, fold)
    rows_f, Cl = x2d.shape
    scale2d = scale_row.reshape(1, Cl)
    shift2d = shift_row.reshape(1, Cl)

    sub = _sublane_multiple(x.dtype)
    vmem_cap = _vmem_capacity_bytes()
    if target_block_bytes is None:
        # 2 buffers x (in + out) x block must stay within ~75% of VMEM.
        target_block_bytes = min(12 << 20, (vmem_cap * 3) // 16)

    # --- Prefer full-row contiguous blocks; only tile the lane dim when even a
    #     minimal (sub-row) full-row block would blow the byte budget. ---
    if Cl * itemsize * sub > target_block_bytes:
        c_tile = max(128, ((target_block_bytes // (sub * itemsize)) // 128) * 128)
        c_tile = min(c_tile, _round_up(Cl, 128))
    else:
        c_tile = Cl

    # --- Row tile: large blocks to amortize per-step overhead, but keep >=2
    #     (even) row blocks on mid/large tensors so "parallel" can shard the row
    #     grid across v7x's 2 TensorCores. ---
    if rows_f <= sub:
        row_tile = rows_f
    else:
        rows_per_block = max(sub, ((target_block_bytes // (c_tile * itemsize)) // sub) * sub)
        n_row_blocks = pl.cdiv(rows_f, rows_per_block)
        if n_row_blocks == 1 and total_bytes > (2 << 20) and rows_f >= 2 * sub:
            n_row_blocks = 2                       # both TCs stream HBM on v7x
        if n_row_blocks > 1 and n_row_blocks % 2 == 1 and rows_f >= (n_row_blocks + 1) * sub:
            n_row_blocks += 1                      # balanced 2-way shard
        if n_row_blocks == 1:
            row_tile = rows_f                      # full dim is a legal block extent
        else:
            row_tile = _round_up(pl.cdiv(rows_f, n_row_blocks), sub)
            if row_tile >= rows_f:
                row_tile = rows_f

    grid = (pl.cdiv(rows_f, row_tile), pl.cdiv(Cl, c_tile))

    # --- Transparent VMEM budget: double-buffered in/out blocks + params + margin,
    #     clamped to 90% of the reported capacity; never below 32 MiB (keeps us
    #     above v5e's 16 MiB scoped default). ---
    block_bytes = row_tile * c_tile * itemsize
    param_bytes = c_tile * itemsize
    vmem_needed = 2 * 2 * block_bytes + 2 * 2 * param_bytes
    vmem_limit = int(min(max(vmem_needed + (2 << 20), 32 << 20), (vmem_cap * 9) // 10))

    extra_kwargs = {}
    if donate_x:
        # True in-place only if the caller donates x at the jit boundary and
        # never reads it again (alias is against the metadata-only 2D view).
        extra_kwargs["input_output_aliases"] = {0: 0}

    out = pl.pallas_call(
        _scale_shift_kernel,
        out_shape=jax.ShapeDtypeStruct((rows_f, Cl), x.dtype),
        grid_spec=pltpu.PrefetchScalarGridSpec(
            num_scalar_prefetch=0,
            grid=grid,
            in_specs=[
                pl.BlockSpec((row_tile, c_tile), lambda i, j: (i, j)),
                pl.BlockSpec((1, c_tile), lambda i, j: (0, j)),
                pl.BlockSpec((1, c_tile), lambda i, j: (0, j)),
            ],
            out_specs=pl.BlockSpec((row_tile, c_tile), lambda i, j: (i, j)),
        ),
        compiler_params=pltpu.CompilerParams(
            dimension_semantics=("parallel", "parallel"),
            vmem_limit_bytes=vmem_limit,
        ),
        **extra_kwargs,
    )(x2d, scale2d, shift2d)

    return out.reshape(orig_shape)


if __name__ == "__main__":
    # Module init: ScaleShift(size=32, scale=2.0, shift=0.5)
    size = 32
    scale_val, shift_val = 2.0, 0.5
    scale = jnp.ones((size,), dtype=jnp.float32) * scale_val
    shift = jnp.ones((size,), dtype=jnp.float32) * shift_val

    # Deterministic input: batch=2, seq=8, hidden=32 (channels-last)
    key = jax.random.PRNGKey(0)
    x = jax.random.normal(key, (2, 8, size), dtype=jnp.float32)

    # Force the Pallas path even for this tiny example so the kernel is exercised.
    y = jax.block_until_ready(scale_shift(x, scale, shift, min_pallas_bytes=0))
    y_ref = x * scale + shift
    assert y.shape == x.shape
    assert jnp.allclose(y, y_ref, atol=1e-6, rtol=1e-6)

    # Second check: bf16 activations with f32 params (dtype-handling path).
    size2 = 256
    scale2 = jnp.ones((size2,), dtype=jnp.float32) * scale_val
    shift2 = jnp.ones((size2,), dtype=jnp.float32) * shift_val
    x2 = jax.random.normal(jax.random.PRNGKey(0), (8, 256, size2), dtype=jnp.bfloat16)
    y2 = jax.block_until_ready(scale_shift(x2, scale2, shift2, min_pallas_bytes=0))
    y2_ref = x2 * scale2.astype(x2.dtype) + shift2.astype(x2.dtype)
    assert y2.dtype == x2.dtype
    assert jnp.allclose(y2.astype(jnp.float32), y2_ref.astype(jnp.float32),
                        atol=2e-2, rtol=2e-2)

    print("KERNEL_OK")
</pallas_src>

<mosaic_0001>
module attributes {stable_mosaic.version = 11 : i64} {
  func.func @_scale_shift_kernel(%arg0: i32, %arg1: i32, %arg2: memref<4x128xf32, #tpu.memory_space<vmem>>, %arg3: memref<1x128xf32, #tpu.memory_space<vmem>>, %arg4: memref<1x128xf32, #tpu.memory_space<vmem>>, %arg5: memref<4x128xf32, #tpu.memory_space<vmem>>) attributes {dimension_semantics = [#tpu.dimension_semantics<parallel>, #tpu.dimension_semantics<parallel>], iteration_bounds = array<i64: 1, 1>, scalar_prefetch = 0 : i64, scratch_operands = 0 : i64, tpu.core_type = #tpu.core_type<tc>, window_params = [{transform_indices = @transform_0, window_bounds = array<i64: 4, 128>}, {transform_indices = @transform_1, window_bounds = array<i64: 1, 128>}, {transform_indices = @transform_2, window_bounds = array<i64: 1, 128>}, {transform_indices = @transform_3, window_bounds = array<i64: 4, 128>}]} {
    %c0 = arith.constant 0 : index
    %c0_0 = arith.constant 0 : index
    %0 = vector.load %arg2[%c0, %c0_0] : memref<4x128xf32, #tpu.memory_space<vmem>>, vector<4x128xf32>
    %c0_1 = arith.constant 0 : index
    %c0_2 = arith.constant 0 : index
    %1 = vector.load %arg3[%c0_1, %c0_2] : memref<1x128xf32, #tpu.memory_space<vmem>>, vector<1x128xf32>
    %2 = vector.broadcast %1 : vector<1x128xf32> to vector<4x128xf32>
    %3 = arith.mulf %0, %2 : vector<4x128xf32>
    %c0_3 = arith.constant 0 : index
    %c0_4 = arith.constant 0 : index
    %4 = vector.load %arg4[%c0_3, %c0_4] : memref<1x128xf32, #tpu.memory_space<vmem>>, vector<1x128xf32>
    %5 = vector.broadcast %4 : vector<1x128xf32> to vector<4x128xf32>
    %6 = arith.addf %3, %5 : vector<4x128xf32>
    %c0_5 = arith.constant 0 : index
    %c0_6 = arith.constant 0 : index
    %7 = vector.load %arg5[%c0_5, %c0_6] : memref<4x128xf32, #tpu.memory_space<vmem>>, vector<4x128xf32>
    tpu.vector_store %arg5[%c0_5, %c0_6], %6 {strides = array<i32>} : memref<4x128xf32, #tpu.memory_space<vmem>>, vector<4x128xf32>,
    return
  }
  func.func @transform_0(%arg0: i32, %arg1: i32) -> (i32, i32) {
    %c0_i32 = arith.constant 0 : i32
    return %arg0, %arg1 : i32, i32
  }
  func.func @transform_1(%arg0: i32, %arg1: i32) -> (i32, i32) {
    %c0_i32 = arith.constant 0 : i32
    %c0_i32_0 = arith.constant 0 : i32
    return %c0_i32, %arg1 : i32, i32
  }
  func.func @transform_2(%arg0: i32, %arg1: i32) -> (i32, i32) {
    %c0_i32 = arith.constant 0 : i32
    %c0_i32_0 = arith.constant 0 : i32
    return %c0_i32, %arg1 : i32, i32
  }
  func.func @transform_3(%arg0: i32, %arg1: i32) -> (i32, i32) {
    %c0_i32 = arith.constant 0 : i32
    return %arg0, %arg1 : i32, i32
  }
}

</mosaic_0001>

<bundles_post_ra>
// kernel: tpu_custom_call.1
= control target key start
LH: loop header
LB: loop body
LE: loop exit
PB: predicated region body
PF: predicated region fallthrough
CT: control target
= control target key end

     0   :  { %8 = vsyncpa [#allocation3], 0  ;;  %s191_s0 = inlined_call_operand.hbm [shape: f32[4,128], index: 0, kind: input, shape index: {}]   ;;  %s192_s1 = inlined_call_operand.hbm [shape: f32[1,128], index: 1, kind: input, shape index: {}]   ;;  %s193_s2 = inlined_call_operand.vmem [shape: f32[1,128], index: 2, kind: input, shape index: {}]   ;;  %s194_s3 = inlined_call_operand.hbm [shape: f32[4,128], index: 3, kind: output, shape index: {}]  }
   0x1   :  { %9 = vsyncpa [#allocation6], 0 }
   0x2   :  { %10 = vsyncpa [#allocation4], 0  ;;  %s16_s14 = sshll.u32 %s191_s0, 4  ;;  %s156_s15 = smov [#allocation2]   ;;  %s17_s14 = int_to_ptr.hbm [resolvable:$true] %s16_s14 }
   0x3   :  { %s18_s16 = sshll.u32 %s156_s15, 4  ;;  %s27_s19 = sshll.u32 %s192_s1, 4  ;;  %s19_s16 = int_to_ptr.vmem [resolvable:$true] %s18_s16  ;;  %s28_s19 = int_to_ptr.hbm [resolvable:$true] %s27_s19 }
   0x4   :  { %21 = dma.hbm_to_vmem [thread:$0]  %s17_s14, 64, %s19_s16, [#allocation3]  }
   0x5   :  { %s157_s20 = smov [#allocation5]  }
   0x6   :  { %s29_s21 = sshll.u32 %s157_s20, 4  ;;  %s30_s21 = int_to_ptr.vmem [resolvable:$true] %s29_s21 }
   0x7   :  { %32 = dma.hbm_to_vmem [thread:$0]  %s28_s19, 16, %s30_s21, [#allocation6]  }
   0x8   :  { %150 = dma.done.wait [#allocation3], 64  }
   0x9   :  { %151 = vsyncadd [#allocation3], 4294967232 }
   0xa   :  { %152 = dma.done.wait [#allocation6], 16  }
   0xb   :  { %153 = vsyncadd [#allocation6], 4294967280  ;;  %v43_v0 = vld [vmem:[#allocation2] sm:$0xf]  ;;  %v76_v1 = vld [vmem:[#allocation5] ss:$0 sm:$0xff] }
   0xc   :  { %v77_v2 = vld [vmem:[%s193_s2] ss:$0 sm:$0xff]  ;;  %s158_s23 = smov [#allocation7]   ;;  %s62_s26 = sshll.u32 %s194_s3, 4  ;;  %v48_v3 = vmul.f32 %v76_v1, %v43_v0  ;;  %s63_s26 = int_to_ptr.hbm [resolvable:$true] %s62_s26 }
   0xd   :  { %s60_s24 = sshll.u32 %s158_s23, 4  ;;  %s61_s24 = int_to_ptr.vmem [resolvable:$true] %s60_s24 }
   0xe   :  { %v53_v4 = vadd.f32 %v77_v2, %v48_v3 }
  0x10   :  { %54 = vst [vmem:[#allocation7] sm:$0xf] %v53_v4 }
  0x11   :  { %65 = dma.vmem_to_hbm [thread:$0]  %s61_s24, 64, %s63_s26, [#allocation4]  }
  0x12   :  { %154 = dma.done.wait [#allocation4], 64  }
  0x13   :  { %155 = vsyncadd [#allocation4], 4294967232 }
  0x14   :  { %70 = vsyncpa [#allocation3], 1 }
  0x15   :  { %71 = vsyncpa [#allocation6], 1 }
  0x16   :  { %72 = vsyncpa [#allocation4], 1 }

</bundles_post_ra>
